<compile_context>
chip_gen: v6e
topology: v6e:2x2x1
jax: 0.10.0
libtpu: 0.0.40
codegen_flags: <defaults>
</compile_context>

<pallas_src>
import jax
import jax.numpy as jnp
from jax.experimental import pallas as pl
from jax.experimental.pallas import tpu as pltpu


def _conv_bn_relu_kernel(w_ref, shift_ref, p_ref, o_ref):
    # w_ref:     (Cp, K)   bf16  BN-scaled conv weights (resident across grid)
    # shift_ref: (Cp, 1)   f32   folded conv-bias + BN shift (resident)
    # p_ref:     (K, ts)   bf16  im2col patch columns for (batch n, spatial tile s)
    # o_ref:     (Cp, ts)  f32   lane-dense output tile (spatial on lanes)
    acc = jnp.dot(w_ref[...], p_ref[...], preferred_element_type=jnp.float32)
    o_ref[...] = jnp.maximum(acc + shift_ref[...], 0.0).astype(o_ref.dtype)


def _fold_bn(conv_w_oihw, conv_b, bn_gamma, bn_beta, bn_mean, bn_var, eps):
    """Fold eval-mode BN into the conv weight/bias.

    Returns (w2d, shift) with w2d: (Cout, Cin*3*3) f32, K ordered (cin, dy, dx)
    to match the im2col layout below, and shift: (Cout,) f32.
    """
    cout = conv_w_oihw.shape[0]
    scale = bn_gamma / jnp.sqrt(bn_var + eps)                    # (Cout,)
    w2d = conv_w_oihw.reshape(cout, -1).astype(jnp.float32)      # (Cout, 9*Cin)
    w2d = w2d * scale[:, None]                                   # fold BN scale
    shift = bn_beta + (conv_b - bn_mean) * scale                 # (Cout,)
    return w2d, shift


def _pick_spatial_tile(hw, max_tile=512):
    """Largest multiple of 128 (<= max_tile) dividing hw; else round-up tile."""
    best = None
    t = 128
    while t <= max_tile:
        if hw % t == 0:
            best = t
        t += 128
    if best is not None:
        return best
    return min(max_tile, pl.cdiv(hw, 128) * 128)


def single_conv_forward(x_nchw, conv_w_oihw, conv_b, bn_gamma, bn_beta,
                        bn_mean, bn_var, eps=1e-5, max_spatial_tile=512):
    """Forward pass of `single_conv` (Conv3x3 s1 p1 + BN(eval) + ReLU).

    x_nchw:      (N, Cin, H, W)      float32
    conv_w_oihw: (Cout, Cin, 3, 3)   float32
    conv_b, bn_*: (Cout,)            float32
    returns:     (N, Cout, H, W)     float32
    """
    N, Cin, H, W = x_nchw.shape
    Cout = conv_w_oihw.shape[0]
    K = 9 * Cin
    HW = H * W

    # ---- fold BN into the weight / shift, pad Cout to the bf16 sublane pack ----
    w2d, shift = _fold_bn(conv_w_oihw, conv_b, bn_gamma, bn_beta,
                          bn_mean, bn_var, eps)
    Cp = max(16, pl.cdiv(Cout, 16) * 16)     # bf16 sublane packing; still << 128
    w_p = jnp.pad(w2d, ((0, Cp - Cout), (0, 0))).astype(jnp.bfloat16)
    shift_p = jnp.pad(shift, (0, Cp - Cout)).reshape(Cp, 1).astype(jnp.float32)

    # ---- wrapper-side im2col in NCHW order (no transposes needed) ----
    # x_pad: (N, Cin, H+2, W+2); taps ordered (dy, dx); K index = cin*9 + dy*3 + dx
    x_pad = jnp.pad(x_nchw.astype(jnp.float32), ((0, 0), (0, 0), (1, 1), (1, 1)))
    taps = [x_pad[:, :, dy:dy + H, dx:dx + W]
            for dy in range(3) for dx in range(3)]
    patches = jnp.stack(taps, axis=2)                       # (N, Cin, 9, H, W)
    p = patches.reshape(N, K, HW).astype(jnp.bfloat16)      # (N, 9*Cin, H*W)

    # ---- spatial tiling (lane-dense output, no pad pass when ts | HW) ----
    ts = _pick_spatial_tile(HW, max_spatial_tile)
    HWp = pl.cdiv(HW, ts) * ts
    if HWp != HW:
        p = jnp.pad(p, ((0, 0), (0, 0), (0, HWp - HW)))

    grid = (N, HWp // ts)
    cost = pl.CostEstimate(
        flops=2 * N * HWp * K * Cp,
        transcendentals=0,
        bytes_accessed=(2 * N * K * HWp          # bf16 patches
                        + 2 * Cp * K             # bf16 weight
                        + 4 * Cp                 # f32 shift
                        + 4 * N * Cp * HWp),     # f32 output
    )

    out = pl.pallas_call(
        _conv_bn_relu_kernel,
        out_shape=jax.ShapeDtypeStruct((N, Cp, HWp), jnp.float32),
        grid_spec=pltpu.PrefetchScalarGridSpec(
            num_scalar_prefetch=0,
            grid=grid,
            in_specs=[
                pl.BlockSpec((Cp, K), lambda n, s: (0, 0)),          # resident weight
                pl.BlockSpec((Cp, 1), lambda n, s: (0, 0)),          # resident shift
                pl.BlockSpec((None, K, ts), lambda n, s: (n, 0, s)),  # patch tile
            ],
            out_specs=pl.BlockSpec((None, Cp, ts), lambda n, s: (n, 0, s)),
        ),
        compiler_params=pltpu.CompilerParams(
            dimension_semantics=("parallel", "parallel"),
        ),
        cost_estimate=cost,
    )(w_p, shift_p, p)

    # already in NCHW channel order: just drop channel / spatial padding
    return out[:, :Cout, :HW].reshape(N, Cout, H, W)


# ---------------------------- references -----------------------------------


def _reference_module(x, conv_w, conv_b, bn_gamma, bn_beta, bn_mean, bn_var,
                      eps=1e-5):
    """Literal eval-mode module math in f32 (conv + bias -> BN -> ReLU)."""
    y = jax.lax.conv_general_dilated(
        x, conv_w, window_strides=(1, 1), padding=((1, 1), (1, 1)),
        dimension_numbers=("NCHW", "OIHW", "NCHW"),
        precision=jax.lax.Precision.HIGHEST)
    y = y + conv_b.reshape(1, -1, 1, 1)
    y = (y - bn_mean.reshape(1, -1, 1, 1)) / jnp.sqrt(
        bn_var.reshape(1, -1, 1, 1) + eps)
    y = y * bn_gamma.reshape(1, -1, 1, 1) + bn_beta.reshape(1, -1, 1, 1)
    return jnp.maximum(y, 0.0)


def _reference_bf16_inputs(x, conv_w, conv_b, bn_gamma, bn_beta, bn_mean,
                           bn_var, eps=1e-5):
    """Same numerics as the kernel: bf16-rounded x / folded weight, f32 accum."""
    cout, cin, kh, kw = conv_w.shape
    w2d, shift = _fold_bn(conv_w, conv_b, bn_gamma, bn_beta, bn_mean, bn_var, eps)
    w_folded = w2d.reshape(cout, cin, kh, kw)
    x_r = x.astype(jnp.bfloat16).astype(jnp.float32)
    w_r = w_folded.astype(jnp.bfloat16).astype(jnp.float32)
    y = jax.lax.conv_general_dilated(
        x_r, w_r, window_strides=(1, 1), padding=((1, 1), (1, 1)),
        dimension_numbers=("NCHW", "OIHW", "NCHW"),
        precision=jax.lax.Precision.HIGHEST)
    return jnp.maximum(y + shift.reshape(1, -1, 1, 1), 0.0)


if __name__ == "__main__":
    # small shapes consistent with single_conv(ch_in=4, ch_out=8)
    N, Cin, Cout, H, W = 2, 4, 8, 16, 16

    key = jax.random.PRNGKey(0)
    k = jax.random.split(key, 7)
    x = jax.random.normal(k[0], (N, Cin, H, W), dtype=jnp.float32)
    conv_w = jax.random.normal(k[1], (Cout, Cin, 3, 3), dtype=jnp.float32) * 0.1
    conv_b = jax.random.normal(k[2], (Cout,), dtype=jnp.float32) * 0.1
    bn_gamma = 1.0 + 0.1 * jax.random.normal(k[3], (Cout,), dtype=jnp.float32)
    bn_beta = 0.1 * jax.random.normal(k[4], (Cout,), dtype=jnp.float32)
    bn_mean = 0.1 * jax.random.normal(k[5], (Cout,), dtype=jnp.float32)
    bn_var = jnp.abs(jax.random.normal(k[6], (Cout,), dtype=jnp.float32)) + 0.5

    out = single_conv_forward(x, conv_w, conv_b, bn_gamma, bn_beta,
                              bn_mean, bn_var)
    out = jax.block_until_ready(out)

    assert out.shape == (N, Cout, H, W)

    # Tight check vs a reference using the same bf16-rounded inputs (verifies
    # the im2col layout / BN fold / kernel indexing exactly).
    ref_tight = _reference_bf16_inputs(x, conv_w, conv_b, bn_gamma, bn_beta,
                                       bn_mean, bn_var)
    assert jnp.allclose(out, ref_tight, atol=1e-4, rtol=1e-4), \
        "mismatch vs bf16-input reference"

    # Loose check vs the f32 eval-mode module reference (bf16 rounding of the
    # K=36 contraction stays well inside this tolerance).
    ref_f32 = _reference_module(x, conv_w, conv_b, bn_gamma, bn_beta,
                                bn_mean, bn_var)
    assert jnp.allclose(out, ref_f32, atol=5e-2, rtol=5e-2), \
        "mismatch vs f32 module reference"

    print("KERNEL_OK")
</pallas_src>

<mosaic_0001>
module attributes {stable_mosaic.version = 11 : i64} {
  func.func @_conv_bn_relu_kernel(%arg0: i32, %arg1: i32, %arg2: memref<16x36xbf16, #tpu.memory_space<vmem>>, %arg3: memref<16x1xf32, #tpu.memory_space<vmem>>, %arg4: memref<1x36x256xbf16, #tpu.memory_space<vmem>>, %arg5: memref<1x16x256xf32, #tpu.memory_space<vmem>>) attributes {dimension_semantics = [#tpu.dimension_semantics<parallel>, #tpu.dimension_semantics<parallel>], iteration_bounds = array<i64: 2, 1>, scalar_prefetch = 0 : i64, scratch_operands = 0 : i64, tpu.core_type = #tpu.core_type<tc>, window_params = [{pipeline_mode = #tpu.pipeline_mode<synchronous>, transform_indices = @transform_0, window_bounds = array<i64: 16, 36>}, {pipeline_mode = #tpu.pipeline_mode<synchronous>, transform_indices = @transform_1, window_bounds = array<i64: 16, 1>}, {transform_indices = @transform_2, window_bounds = array<i64: 1, 36, 256>}, {transform_indices = @transform_3, window_bounds = array<i64: 1, 16, 256>}]} {
    %c0 = arith.constant 0 : index
    %c0_0 = arith.constant 0 : index
    %0 = vector.load %arg2[%c0, %c0_0] : memref<16x36xbf16, #tpu.memory_space<vmem>>, vector<16x36xbf16>
    %c0_1 = arith.constant 0 : index
    %c0_2 = arith.constant 0 : index
    %c0_3 = arith.constant 0 : index
    %1 = vector.load %arg4[%c0_1, %c0_2, %c0_3] : memref<1x36x256xbf16, #tpu.memory_space<vmem>>, vector<1x36x256xbf16>
    %2 = vector.shape_cast %1 : vector<1x36x256xbf16> to vector<36x256xbf16>
    %cst = arith.constant dense<0.000000e+00> : vector<16x256xf32>
    %3 = tpu.matmul %0, %2, %cst {dimension_numbers = #tpu.dot_dimension_numbers<[1], [0], [0], [1], [0, 0, 1, 1], [], []>} : vector<16x36xbf16>, vector<36x256xbf16>, vector<16x256xf32> -> vector<16x256xf32>
    %c0_4 = arith.constant 0 : index
    %c0_5 = arith.constant 0 : index
    %4 = vector.load %arg3[%c0_4, %c0_5] : memref<16x1xf32, #tpu.memory_space<vmem>>, vector<16x1xf32>
    %5 = vector.broadcast %4 : vector<16x1xf32> to vector<16x256xf32>
    %6 = arith.addf %3, %5 : vector<16x256xf32>
    %cst_6 = arith.constant 0.000000e+00 : f32
    %7 = vector.broadcast %cst_6 : f32 to vector<16x256xf32>
    %8 = arith.maximumf %6, %7 : vector<16x256xf32>
    %c0_7 = arith.constant 0 : index
    %c0_8 = arith.constant 0 : index
    %c0_9 = arith.constant 0 : index
    %9 = vector.load %arg5[%c0_7, %c0_8, %c0_9] : memref<1x16x256xf32, #tpu.memory_space<vmem>>, vector<1x16x256xf32>
    %10 = vector.shape_cast %9 : vector<1x16x256xf32> to vector<16x256xf32>
    %11 = vector.shape_cast %8 : vector<16x256xf32> to vector<1x16x256xf32>
    tpu.vector_store %arg5[%c0_7, %c0_8, %c0_9], %11 {strides = array<i32>} : memref<1x16x256xf32, #tpu.memory_space<vmem>>, vector<1x16x256xf32>,
    return
  }
  func.func @transform_0(%arg0: i32, %arg1: i32) -> (i32, i32) {
    %c0_i32 = arith.constant 0 : i32
    %c0_i32_0 = arith.constant 0 : i32
    %c0_i32_1 = arith.constant 0 : i32
    return %c0_i32, %c0_i32_0 : i32, i32
  }
  func.func @transform_1(%arg0: i32, %arg1: i32) -> (i32, i32) {
    %c0_i32 = arith.constant 0 : i32
    %c0_i32_0 = arith.constant 0 : i32
    %c0_i32_1 = arith.constant 0 : i32
    return %c0_i32, %c0_i32_0 : i32, i32
  }
  func.func @transform_2(%arg0: i32, %arg1: i32) -> (i32, i32, i32) {
    %c0_i32 = arith.constant 0 : i32
    %c0_i32_0 = arith.constant 0 : i32
    return %arg0, %c0_i32, %arg1 : i32, i32, i32
  }
  func.func @transform_3(%arg0: i32, %arg1: i32) -> (i32, i32, i32) {
    %c0_i32 = arith.constant 0 : i32
    %c0_i32_0 = arith.constant 0 : i32
    return %arg0, %c0_i32, %arg1 : i32, i32, i32
  }
}

</mosaic_0001>

<bundles_post_ra>
// kernel: tpu_custom_call.1
= control target key start
LH: loop header
LB: loop body
LE: loop exit
PB: predicated region body
PF: predicated region fallthrough
CT: control target
= control target key end

     0   :  { %8 = vsyncpa [#allocation3], 0  ;;  %s723_s0 = inlined_call_operand.vmem [shape: bf16[16,36], index: 0, kind: input, shape index: {}]   ;;  %s724_s1 = inlined_call_operand.vmem [shape: f32[16,1], index: 1, kind: input, shape index: {}]   ;;  %s725_s2 = inlined_call_operand.vmem [shape: bf16[2,36,256], index: 2, kind: input, shape index: {}]   ;;  %s726_s3 = inlined_call_operand.hbm [shape: f32[2,16,256], index: 3, kind: output, shape index: {}]  }
   0x1   :  { %10 = vsyncpa [#allocation3 + $0x1], 0  ;;  %s600_s12 = smov 0   ;;  %s602_s13 = smov 0  }
   0x2   :  { %s604_s14 = smov 0   ;;  %s606_s15 = smov 0  }
   0x3   :  { %s608_s16 = smov 0   ;;  %s610_s17 = smov 0  }
   0x4 LB: > { %s407_s18 = sadd.s32 4294967295, %s574_s17   ;;  %s408_s19 = sadd.s32 4294967294, %s574_s17   ;;  %s574_s17 = sphi %s610_s17, %s16_s17   ;;  %s570_s16 = sphi %s608_s16, %s733_s16   ;;  %s566_s15 = sphi %s606_s15, %s732_s15   ;;  %s562_s14 = sphi %s604_s14, %s731_s14   ;;  %s558_s13 = sphi %s602_s13, %s730_s13   ;;  %s554_s12 = sphi %s600_s12, %s729_s12  }
   0x5   : > { %s28_s20 = sadd.s32 1, %s570_s16  ;;  %s107_s21 = sadd.s32 1, %s562_s14 }
   0x6   : > { %p30_p0 = scmp.ge.s32.totalorder %s28_s20, 2  ;;  %p117_p1 = scmp.ne.s32.totalorder %s562_s14, %s558_s13 }
   0x7   : > { %p118_p2 = scmp.eq.s32.totalorder %s407_s18, 1  ;;  %p123_p3 = scmp.ne.s32.totalorder %s558_s13, %s554_s12 }
   0x8   : > { %s735_s20 = smov (%p30_p0, %s28_s20), 0  ;;  %p124_p5 = scmp.eq.s32.totalorder %s408_s19, 1 }
   0x9   : > { %p640_p4 = por %p118_p2, %p117_p1  ;;  %s102_s23 = ssub.s32 %s570_s16, %s735_s20 }
   0xa   : > { %p411_p6 = scmp.ge.s32.totalorder %s574_s17, 1  ;;  %p105_p7 = scmp.eq.s32.totalorder %s102_s23, 0 }
   0xb   : > { %p647_p8 = por %p124_p5, %p123_p3  ;;  %p161_p9 = scmp.lt.s32.totalorder %s574_s17, 3 }
   0xc   : > { %s653_s25 = scalar_select %p105_p7, %s562_s14, %s107_s21  }
   0xd   : > { %p162_p10 = pnand %p411_p6, %p161_p9 }
   0xe   : > { %p190_p11 = scmp.lt.s32.totalorder (!%p162_p10), %s566_s15, 1  ;;  %s186_s10 = sand.u32 (!%p162_p10), 1, %s558_s13  }
   0xf   : > { %165 = sbr.rel (%p162_p10) target bundleno = 257 (0x101), region = 32  ;;  %s412_s11 = sshll.u32 (!%p162_p10), %s186_s10, 5 }
  0x10   : > { %s188_s18 = scalar_lea.vmem (!%p162_p10), [#allocation2], %s412_s11  ;;  %s428_s21 = sshll.u32 (!%p162_p10), %s566_s15, 9 }
  0x11   : > { %s328_s19 = sshll.u32 (!%p162_p10), %s188_s18, 4  ;;  %s676_s27 = scalar_lea.hbm (!%p162_p10), %s726_s3, %s428_s21  ;;  %s671_s19 = int_to_ptr.vmem [resolvable:$true] %s328_s19 }
  0x12   : > { %s577_s29 = smov (!%p162_p10), [#allocation2]  }
  0x13   : > { %s502_s30 = sshll.u32 (!%p162_p10), %s577_s29, 4  ;;  %s503_s30 = int_to_ptr.vmem [resolvable:$false] %s502_s30 }
  0x14   : > { %v576_v0 = vmov 0   ;;  %v208_v1 = vld [vmem:[%s724_s1] sm:$0xff]  ;;  %s191_s28 = scalar_select %p190_p11, %s566_s15, 1  ;;  %v209_v2 = vld [vmem:[%s724_s1 + $0x8] sm:$0xff]  ;;  %vm254_vm0 = vcmask 1041408   ;;  %vm250_vm1 = vcmask 293888  }
  0x15   : > { %293 = vmatprep.mubr.bf16.mxu0 %v576_v0  ;;  %488 = vset.pattern.permute.xlu0 %v576_v0  ;;  %v497_v11 = vld [vmem:[%s723_s0] sm:$0xff]   ;;  %s498_s15 = scalar_lea.vmem %s671_s19, 512  ;;  %p505_p1 = scmp.lt.s32.totalorder %s671_s19, %s503_s30 }
  0x16   : > { %212 = vperm.xlu0 %488, %v208_v1   ;;  %s429_s4 = smul.u32 40, %s191_s28  ;;  %s678_s28 = scalar_lea.sflag [#allocation3], %s186_s10 }
  0x17   : > { %p499_p12 = scmp.ne.s32.totalorder %s671_s19, %s498_s15 }
  0x18   : > { %s197_s7 = scalar_lea.vmem %s725_s2, %s429_s4  ;;  %s504_s4 = scalar_lea.vmem %s503_s30, 1024 }
  0x19   : > { %v207_v3 = vld [vmem:[%s197_s7 + $0x20] sm:$0x33]  ;;  %v491_v6 = vld [vmem:[%s197_s7 + $0x14] ss:$8 sps:$4 sm:$0xff]   ;;  %v493_v8 = vld [vmem:[%s197_s7 + $0x10] ss:$8 sps:$4 sm:$0xff]   ;;  %p500_p13 = pnand %p499_p12, %p640_p4  ;;  %p506_p2 = scmp.lt.s32.totalorder %s504_s4, %s498_s15 }
  0x1a   : > { %217 = vperm.xlu0 %488, %v209_v2   ;;  %v420_v4 = vcombine.high %v207_v3, %v207_v3  ;;  %v419_v5 = vcombine.low %v207_v3, %v207_v3  ;;  %v494_v9 = vld [vmem:[%s197_s7 + $0x4] ss:$8 sps:$4 sm:$0xff]   ;;  %v496_v10 = vld [vmem:[%s197_s7] ss:$8 sps:$4 sm:$0xff]  }
  0x1b   : > { %p501_p0 = pneg %p500_p13  ;;  %p507_p3 = por %p506_p2, %p505_p1 }
  0x1c   : > { %421 = vmatprep.subr.msk.bf16.mxu0 %vm254_vm0, %v420_v4  ;;  %v256_v7 = vsel %vm254_vm0, %v419_v5, 0 }
  0x1d   : > { %272 = vmatpush1.bf16.msra.mxu0 %v256_v7  ;;  %p508_p5 = pnand %p507_p3, %p501_p0 }
  0x1e   : > { %273 = vmatprep.subr.bf16.mxu0 %v491_v6 }
  0x21   : > { %274 = vmatpush1.bf16.msra.mxu0 %v493_v8 }
  0x22   : > { %275 = vmatprep.subr.bf16.mxu0 %v494_v9 }
  0x25   : > { %276 = vmatpush1.bf16.msra.mxu0 %v496_v10 }
  0x28   : > { %422 = vmatmul.mubr.msk.bf16.vlgmr.msra.gmra.mxu0 %vm250_vm1, %v497_v11 }
  0x91   : > { %v213_v12 = vpop.permute.xlu0 %212 }
  0x95   : > { %v218_v18 = vpop.permute.xlu0 %217 }
  0xe8   : > { %v295_v13 = vpop.f32.mrf.mxu0 }
  0xe9   : > { %v296_v14 = vadd.f32 %v295_v13, %v213_v12 }
  0xea   : > { %v297_v15 = vpop.f32.mrf.mxu0 }
  0xeb   : > { %v304_v16 = vmax.f32 %v296_v14, 0.0  ;;  %v298_v17 = vadd.f32 %v297_v15, %v213_v12 }
  0xec   : > { %v299_v19 = vpop.f32.mrf.mxu0 }
  0xed   : > { %308 = vst [vmem:[%s188_s18] sm:$0xff] %v304_v16  ;;  %v305_v20 = vmax.f32 %v298_v17, 0.0  ;;  %v300_v21 = vadd.f32 %v299_v19, %v218_v18 }
  0xee   : > { %v301_v22 = vpop.f32.mrf.mxu0 }
  0xef   : > { %309 = vst [vmem:[%s188_s18 + $0x8] sm:$0xff] %v305_v20  ;;  %v306_v23 = vmax.f32 %v300_v21, 0.0  ;;  %v302_v24 = vadd.f32 %v301_v22, %v218_v18 }
  0xf1   : > { %310 = vst [vmem:[%s188_s18 + $0x10] sm:$0xff] %v306_v23  ;;  %v307_v25 = vmax.f32 %v302_v24, 0.0 }
  0xf3   : > { %311 = vst [vmem:[%s188_s18 + $0x18] sm:$0xff] %v307_v25 }
  0xf4   : > { %511 = shalt.err (!%p508_p5)
}
  0xf5   : > { %s512_s5 = scalar_lea.hbm %s676_s27, 512  ;;  %s516_s8 = scalar_lea.hbm %s726_s3, 1024 }
  0xf6   : > { %p513_p6 = scmp.ne.s32.totalorder %s676_s27, %s512_s5  ;;  %p517_p10 = scmp.lt.s32.totalorder %s676_s27, %s726_s3 }
  0xf7   : > { %p518_p11 = scmp.lt.s32.totalorder %s516_s8, %s512_s5 }
  0xf8   : > { %p514_p7 = pnand %p513_p6, %p640_p4 }
  0xf9   : > { %p519_p12 = por %p518_p11, %p517_p10 }
  0xfa   : > { %p515_p9 = pneg %p514_p7 }
  0xfc   : > { %p520_p13 = pnand %p519_p12, %p515_p9 }
  0xfe   : > { %523 = shalt.err (!%p520_p13)
}
  0xff   : > { %s578_s11 = smov 256   ;;  %s579_s18 = smov 16  }
 0x100   : > { %430 = dma.vmem_to_hbm [thread:$0]  (%p640_p4), %s671_s19, 512, %s676_s27, %s678_s28, %s578_s11, %s578_s11, %s579_s18  }
 0x101 PF: > { %p436_p0 = scmp.ge.s32.totalorder %s574_s17, 2  ;;  %s343_s21 = sand.u32 1, %s554_s12  }
 0x102   : > { %s344_s23 = scalar_lea.sflag [#allocation3], %s343_s21 }
 0x103   : > { %p433_p1 = pnand %p436_p0, %p647_p8 }
 0x105   : > { %p434_p2 = pneg %p433_p1 }
 0x107   : > { %549 = dma.done.wait (%p434_p2), %s344_s23, 512  }
 0x108   : > { %551 = vsyncadd (%p434_p2), %s344_s23, 4294966784  ;;  %s16_s17 = sadd.s32 1, %s574_s17   ;;  %s729_s12 = smov %s558_s13 }
 0x109   : > { %p13_p3 = scmp.ge.s32.totalorder %s16_s17, 4   ;;  %s730_s13 = smov %s562_s14 }
 0x10a   : > { %s731_s14 = smov %s653_s25  ;;  %s732_s15 = smov %s570_s16 }
 0x10b   : > { %s733_s16 = smov %s735_s20  ;;  %15 = sbr.rel (!%p13_p3) target bundleno = 4 (0x4), region = 67 }
 0x110   :  { %349 = vsyncpa [#allocation3], 1 }
 0x111   :  { %351 = vsyncpa [#allocation3 + $0x1], 1 }

</bundles_post_ra>
